<compile_context>
chip_gen: v5e
topology: v5e:2x2
jax: 0.10.0
libtpu: 0.0.40
codegen_flags: <defaults>
</compile_context>

<pallas_src>
import functools

import jax
import jax.numpy as jnp
from jax.experimental import pallas as pl
from jax.experimental.pallas import tpu as pltpu


# ---------------------------------------------------------------------------
# Constants
# ---------------------------------------------------------------------------

FEATURE_DIM = 2048     # inception_v3 feature width feeding `self.last`
N_OUTPUTS = 100
N_OUTPUTS_PAD = 128    # lane-dense head output (sliced back to 100)
NC_PER_TASK = 10
STEM1_C = 32           # like Conv2d_1a_3x3 in the inception stem
STEM1_C_PAD = 128      # lane-dense conv1 output channels (zero-padded)


def _round_up(x, m):
    return ((x + m - 1) // m) * m


# ---------------------------------------------------------------------------
# Pallas kernels
# ---------------------------------------------------------------------------

def _conv_matmul_kernel(patches_ref, w_ref, scale_ref, bias_ref, out_ref):
    """Tiled im2col conv: bf16 [TM,K] @ bf16 [K,TN] -> f32, BN scale/bias, ReLU."""
    acc = jnp.dot(patches_ref[...], w_ref[...],
                  preferred_element_type=jnp.float32)
    act = jnp.maximum(acc * scale_ref[...] + bias_ref[...], jnp.float32(0.0))
    out_ref[...] = act.astype(out_ref.dtype)


def _conv_gap_kernel(patches_ref, w_ref, scale_ref, bias_ref, out_ref, acc_ref,
                     *, s_true, inv_s):
    """Conv (im2col matmul) + BN + ReLU with global-average-pool fused.

    Grid: (batch, N-tiles, spatial-tiles); spatial is the (last, 'arbitrary')
    reduction axis. The output block (one (1,TN) row per batch / N-tile) is
    revisited across spatial tiles; acc_ref holds the running f32 sum.
    """
    s_idx = pl.program_id(2)

    @pl.when(s_idx == 0)
    def _():
        acc_ref[...] = jnp.zeros_like(acc_ref)

    p = patches_ref[0]                                   # [TS, K]  (bf16)
    acc = jnp.dot(p, w_ref[...], preferred_element_type=jnp.float32)
    act = jnp.maximum(acc * scale_ref[...] + bias_ref[...], jnp.float32(0.0))

    # Mask rows that are only spatial padding (they would contribute
    # ReLU(bias) to the pooled sum otherwise).
    ts = act.shape[0]
    row = s_idx * ts + jax.lax.broadcasted_iota(jnp.int32, (ts, 1), 0)
    act = jnp.where(row < s_true, act, jnp.float32(0.0))

    acc_ref[...] += jnp.sum(act, axis=0, keepdims=True)  # [1, TN]

    @pl.when(s_idx == pl.num_programs(2) - 1)
    def _():
        out_ref[0] = (acc_ref[...] * jnp.float32(inv_s)).astype(out_ref.dtype)


def _head_kernel(off_ref, h_ref, w_ref, b_ref, out_ref):
    """Linear(2048, 128-padded) + continual-task masking (fill -1e11)."""
    logits = jnp.dot(h_ref[...], w_ref[...],
                     preferred_element_type=jnp.float32) + b_ref[...]
    col = jax.lax.broadcasted_iota(jnp.int32, logits.shape, 1)
    keep = (col >= off_ref[0]) & (col < off_ref[1])
    out_ref[...] = jnp.where(keep, logits, jnp.float32(-100000000000.0))


# ---------------------------------------------------------------------------
# Wrappers (glue: layout, im2col, pallas_call plumbing)
# ---------------------------------------------------------------------------

def _conv_bn_relu(x_nhwc, w_mat, scale, bias, kh, kw, stride, *, tm=256):
    """x: [B,H,W,Cin] -> [B,Ho,Wo,Cout] (bf16). VALID padding, given stride.

    Tiled over the M = B*Ho*Wo axis; Cout is already lane-dense (128-mult).
    """
    B, H, W, Cin = x_nhwc.shape
    K, N = w_mat.shape                       # K == kh*kw*Cin, N == Cout (padded)
    Ho = (H - kh) // stride + 1
    Wo = (W - kw) // stride + 1

    # im2col (glue). Feature ordering ((kh*KW + kw)*Cin + ci) matches the
    # [KH*KW*Cin, Cout] reshape of the HWIO weight.
    cols = []
    for i in range(kh):
        for j in range(kw):
            cols.append(x_nhwc[:, i:i + stride * Ho:stride,
                               j:j + stride * Wo:stride, :])
    patches = jnp.concatenate(cols, axis=-1).reshape(B * Ho * Wo, K)
    patches = patches.astype(jnp.bfloat16)

    M = B * Ho * Wo
    TM = min(tm, _round_up(M, 16))
    M_pad = _round_up(M, TM)
    if M_pad != M:
        patches = jnp.pad(patches, ((0, M_pad - M), (0, 0)))
    TN = min(512, N)
    assert N % TN == 0

    out = pl.pallas_call(
        _conv_matmul_kernel,
        out_shape=jax.ShapeDtypeStruct((M_pad, N), jnp.bfloat16),
        grid=(M_pad // TM, N // TN),
        in_specs=[
            pl.BlockSpec((TM, K), lambda i, j: (i, 0)),
            pl.BlockSpec((K, TN), lambda i, j: (0, j)),
            pl.BlockSpec((1, TN), lambda i, j: (0, j)),   # resident along M
            pl.BlockSpec((1, TN), lambda i, j: (0, j)),
        ],
        out_specs=pl.BlockSpec((TM, TN), lambda i, j: (i, j)),
        compiler_params=pltpu.CompilerParams(
            dimension_semantics=("parallel", "parallel")),
    )(patches, w_mat, scale, bias)

    return out[:M].reshape(B, Ho, Wo, N)


def _conv_bn_relu_gap(x_nhwc, w_mat, scale, bias, kh, kw, *, ts=256, tn=512):
    """Conv (3x3, stride 1, VALID) + BN + ReLU + global-average-pool -> [B, Cout]."""
    B, H, W, Cin = x_nhwc.shape
    K, N = w_mat.shape
    Ho = H - kh + 1
    Wo = W - kw + 1
    S = Ho * Wo

    cols = []
    for i in range(kh):
        for j in range(kw):
            cols.append(x_nhwc[:, i:i + Ho, j:j + Wo, :])
    patches = jnp.concatenate(cols, axis=-1).reshape(B, S, K).astype(jnp.bfloat16)

    TS = min(ts, _round_up(S, 16))
    S_pad = _round_up(S, TS)
    if S_pad != S:
        patches = jnp.pad(patches, ((0, 0), (0, S_pad - S), (0, 0)))
    TN = min(tn, N)
    assert N % TN == 0

    kernel = functools.partial(_conv_gap_kernel, s_true=S, inv_s=1.0 / S)

    out = pl.pallas_call(
        kernel,
        out_shape=jax.ShapeDtypeStruct((B, 1, N), jnp.float32),
        grid=(B, N // TN, S_pad // TS),
        in_specs=[
            pl.BlockSpec((1, TS, K), lambda b, n, s: (b, s, 0)),
            pl.BlockSpec((K, TN), lambda b, n, s: (0, n)),
            pl.BlockSpec((1, TN), lambda b, n, s: (0, n)),   # resident along s
            pl.BlockSpec((1, TN), lambda b, n, s: (0, n)),
        ],
        out_specs=pl.BlockSpec((1, 1, TN), lambda b, n, s: (b, 0, n)),
        scratch_shapes=[pltpu.VMEM((1, TN), jnp.float32)],
        compiler_params=pltpu.CompilerParams(
            dimension_semantics=("parallel", "parallel", "arbitrary")),
    )(patches, w_mat, scale, bias)

    return out.reshape(B, N)


def _head(h, w_pad, bias_pad, offsets):
    """Linear(2048, 128-padded) + continual masking; caller slices to 100."""
    B, D = h.shape
    _, Np = w_pad.shape
    h_bf16 = h.astype(jnp.bfloat16)
    return pl.pallas_call(
        _head_kernel,
        out_shape=jax.ShapeDtypeStruct((B, Np), jnp.float32),
        grid=(1,),
        in_specs=[
            pl.BlockSpec(memory_space=pltpu.MemorySpace.SMEM),  # offsets (2,)
            pl.BlockSpec((B, D), lambda i: (0, 0)),
            pl.BlockSpec((D, Np), lambda i: (0, 0)),
            pl.BlockSpec((1, Np), lambda i: (0, 0)),
        ],
        out_specs=pl.BlockSpec((B, Np), lambda i: (0, 0)),
    )(offsets, h_bf16, w_pad, bias_pad)


# ---------------------------------------------------------------------------
# Model: deterministic synthetic parameters + forward
# ---------------------------------------------------------------------------

def init_params(key):
    ks = jax.random.split(key, 6)
    # stem conv 1: 3x3 / stride 2, 3 -> 32, folded BN scale/bias
    w1 = 0.1 * jax.random.normal(ks[0], (3, 3, 3, STEM1_C), jnp.float32)
    s1 = 1.0 + 0.05 * jax.random.normal(ks[1], (1, STEM1_C), jnp.float32)
    b1 = 0.05 * jax.random.normal(ks[2], (1, STEM1_C), jnp.float32)
    # stand-in conv 2: 3x3 / stride 1, 32 -> 2048
    w2 = 0.05 * jax.random.normal(ks[3], (3, 3, STEM1_C, FEATURE_DIM), jnp.float32)
    s2 = jnp.ones((1, FEATURE_DIM), jnp.float32)
    b2 = jnp.zeros((1, FEATURE_DIM), jnp.float32)
    # head Linear(2048, 100): stored pre-transposed as [in, out]
    wl = 0.02 * jax.random.normal(ks[4], (FEATURE_DIM, N_OUTPUTS), jnp.float32)
    bl = 0.02 * jax.random.normal(ks[5], (1, N_OUTPUTS), jnp.float32)

    # --- lane-density padding (numerics unchanged) ---
    pad_c = STEM1_C_PAD - STEM1_C
    w1p = jnp.pad(w1, ((0, 0), (0, 0), (0, 0), (0, pad_c)))            # zeros
    s1p = jnp.pad(s1, ((0, 0), (0, pad_c)), constant_values=1.0)       # scale=1
    b1p = jnp.pad(b1, ((0, 0), (0, pad_c)))                            # bias=0
    w2p = jnp.pad(w2, ((0, 0), (0, 0), (0, pad_c), (0, 0)))            # zero K rows

    pad_n = N_OUTPUTS_PAD - N_OUTPUTS
    wlp = jnp.pad(wl, ((0, 0), (0, pad_n)))
    blp = jnp.pad(bl, ((0, 0), (0, pad_n)))

    return {
        "w1": w1p.reshape(3 * 3 * 3, STEM1_C_PAD).astype(jnp.bfloat16),
        "s1": s1p, "b1": b1p,
        "w2": w2p.reshape(3 * 3 * STEM1_C_PAD, FEATURE_DIM).astype(jnp.bfloat16),
        "s2": s2, "b2": b2,
        "wl": wlp.astype(jnp.bfloat16),
        "bl": blp,
    }


def rep_tail_inception_v3_forward(params, x_nchw, t, pre=False, is_con=True):
    """Eval-mode forward (aux logits of the training branch are discarded
    by the reference module anyway)."""
    x = jnp.transpose(x_nchw, (0, 2, 3, 1)).astype(jnp.float32)   # NCHW -> NHWC

    # feature_net (synthetic stem, see TODO(synk) above)
    h = _conv_bn_relu(x, params["w1"], params["s1"], params["b1"],
                      kh=3, kw=3, stride=2)                       # [B,Ho,Wo,128] bf16
    feats = _conv_bn_relu_gap(h, params["w2"], params["s2"], params["b2"],
                              kh=3, kw=3)                         # [B, 2048] f32

    # continual-learning output masking, identical to the reference semantics
    if is_con:
        if pre:
            off1, off2 = 0, int(t * NC_PER_TASK)
        else:
            off1, off2 = int(t * NC_PER_TASK), int((t + 1) * NC_PER_TASK)
    else:
        off1, off2 = 0, N_OUTPUTS
    offsets = jnp.array([off1, off2], dtype=jnp.int32)

    logits_pad = _head(feats, params["wl"], params["bl"], offsets)  # [B, 128]
    return logits_pad[:, :N_OUTPUTS]                                # [B, 100]


# ---------------------------------------------------------------------------

if __name__ == "__main__":
    key = jax.random.PRNGKey(0)
    pkey, xkey = jax.random.split(key)
    params = init_params(pkey)

    # small synthetic input (inception takes NCHW, 3 channels)
    x = jax.random.normal(xkey, (2, 3, 16, 16), jnp.float32)
    t = 2

    out = rep_tail_inception_v3_forward(params, x, t, pre=False, is_con=True)
    out = jax.block_until_ready(out)

    assert out.shape == (2, N_OUTPUTS)
    # sanity: columns outside task-t slice are filled with -1e11
    assert bool(jnp.all(out[:, : t * NC_PER_TASK] == -100000000000.0))
    assert bool(jnp.all(out[:, (t + 1) * NC_PER_TASK:] == -100000000000.0))
    assert bool(jnp.all(jnp.isfinite(out[:, t * NC_PER_TASK:(t + 1) * NC_PER_TASK])))

    print("KERNEL_OK")
</pallas_src>

<mosaic_0001>
module attributes {stable_mosaic.version = 11 : i64} {
  func.func @_conv_matmul_kernel(%arg0: i32, %arg1: i32, %arg2: memref<112x27xbf16, #tpu.memory_space<vmem>>, %arg3: memref<27x128xbf16, #tpu.memory_space<vmem>>, %arg4: memref<1x128xf32, #tpu.memory_space<vmem>>, %arg5: memref<1x128xf32, #tpu.memory_space<vmem>>, %arg6: memref<112x128xbf16, #tpu.memory_space<vmem>>) attributes {dimension_semantics = [#tpu.dimension_semantics<parallel>, #tpu.dimension_semantics<parallel>], iteration_bounds = array<i64: 1, 1>, scalar_prefetch = 0 : i64, scratch_operands = 0 : i64, tpu.core_type = #tpu.core_type<tc>, window_params = [{transform_indices = @transform_0, window_bounds = array<i64: 112, 27>}, {transform_indices = @transform_1, window_bounds = array<i64: 27, 128>}, {transform_indices = @transform_2, window_bounds = array<i64: 1, 128>}, {transform_indices = @transform_3, window_bounds = array<i64: 1, 128>}, {transform_indices = @transform_4, window_bounds = array<i64: 112, 128>}]} {
    %c0 = arith.constant 0 : index
    %c0_0 = arith.constant 0 : index
    %0 = vector.load %arg2[%c0, %c0_0] : memref<112x27xbf16, #tpu.memory_space<vmem>>, vector<112x27xbf16>
    %c0_1 = arith.constant 0 : index
    %c0_2 = arith.constant 0 : index
    %1 = vector.load %arg3[%c0_1, %c0_2] : memref<27x128xbf16, #tpu.memory_space<vmem>>, vector<27x128xbf16>
    %cst = arith.constant dense<0.000000e+00> : vector<112x128xf32>
    %2 = tpu.matmul %0, %1, %cst {dimension_numbers = #tpu.dot_dimension_numbers<[1], [0], [0], [1], [0, 0, 1, 1], [], []>} : vector<112x27xbf16>, vector<27x128xbf16>, vector<112x128xf32> -> vector<112x128xf32>
    %c0_3 = arith.constant 0 : index
    %c0_4 = arith.constant 0 : index
    %3 = vector.load %arg4[%c0_3, %c0_4] : memref<1x128xf32, #tpu.memory_space<vmem>>, vector<1x128xf32>
    %4 = vector.broadcast %3 : vector<1x128xf32> to vector<112x128xf32>
    %5 = arith.mulf %2, %4 : vector<112x128xf32>
    %c0_5 = arith.constant 0 : index
    %c0_6 = arith.constant 0 : index
    %6 = vector.load %arg5[%c0_5, %c0_6] : memref<1x128xf32, #tpu.memory_space<vmem>>, vector<1x128xf32>
    %7 = vector.broadcast %6 : vector<1x128xf32> to vector<112x128xf32>
    %8 = arith.addf %5, %7 : vector<112x128xf32>
    %cst_7 = arith.constant 0.000000e+00 : f32
    %9 = vector.broadcast %cst_7 : f32 to vector<112x128xf32>
    %10 = arith.maximumf %8, %9 : vector<112x128xf32>
    %11 = arith.truncf %10 : vector<112x128xf32> to vector<112x128xbf16>
    %c0_8 = arith.constant 0 : index
    %c0_9 = arith.constant 0 : index
    %12 = vector.load %arg6[%c0_8, %c0_9] : memref<112x128xbf16, #tpu.memory_space<vmem>>, vector<112x128xbf16>
    tpu.vector_store %arg6[%c0_8, %c0_9], %11 {strides = array<i32>} : memref<112x128xbf16, #tpu.memory_space<vmem>>, vector<112x128xbf16>,
    return
  }
  func.func @transform_0(%arg0: i32, %arg1: i32) -> (i32, i32) {
    %c0_i32 = arith.constant 0 : i32
    %c0_i32_0 = arith.constant 0 : i32
    return %arg0, %c0_i32 : i32, i32
  }
  func.func @transform_1(%arg0: i32, %arg1: i32) -> (i32, i32) {
    %c0_i32 = arith.constant 0 : i32
    %c0_i32_0 = arith.constant 0 : i32
    return %c0_i32, %arg1 : i32, i32
  }
  func.func @transform_2(%arg0: i32, %arg1: i32) -> (i32, i32) {
    %c0_i32 = arith.constant 0 : i32
    %c0_i32_0 = arith.constant 0 : i32
    return %c0_i32, %arg1 : i32, i32
  }
  func.func @transform_3(%arg0: i32, %arg1: i32) -> (i32, i32) {
    %c0_i32 = arith.constant 0 : i32
    %c0_i32_0 = arith.constant 0 : i32
    return %c0_i32, %arg1 : i32, i32
  }
  func.func @transform_4(%arg0: i32, %arg1: i32) -> (i32, i32) {
    %c0_i32 = arith.constant 0 : i32
    return %arg0, %arg1 : i32, i32
  }
}

</mosaic_0001>

<bundles_post_ra>
// kernel: tpu_custom_call.1
= control target key start
LH: loop header
LB: loop body
LE: loop exit
PB: predicated region body
PF: predicated region fallthrough
CT: control target
= control target key end

     0   :  { %vm105_vm0 = vcmask 1044480   ;;  %vm106_vm1 = vcmask 1045504   ;;  %v383_v3 = vmov 65535   ;;  %s467_s0 = inlined_call_operand.vmem [shape: bf16[112,27], index: 0, kind: input, shape index: {}]   ;;  %s468_s1 = inlined_call_operand.vmem [shape: bf16[27,128], index: 1, kind: input, shape index: {}]   ;;  %s469_s2 = inlined_call_operand.vmem [shape: f32[1,128], index: 2, kind: input, shape index: {}]   ;;  %s470_s3 = inlined_call_operand.vmem [shape: f32[1,128], index: 3, kind: input, shape index: {}]   ;;  %s471_s4 = inlined_call_operand.hbm [shape: bf16[112,128], index: 4, kind: output, shape index: {}]  }
   0x1   :  { %v286_v0 = vld [vmem:[%s468_s1 + $0x8] sm:$0xf]  ;;  %v303_v1 = vld [vmem:[%s468_s1 + $0x8] sm:$0x30]  ;;  %v107_v4 = vsel %vm105_vm0, 4294967295, %v383_v3 }
   0x2   :  { %v287_v2 = vor.u32 %v303_v1, %v286_v0  ;;  %v108_v5 = vsel %vm106_vm1, %v107_v4, 0 }
   0x4   :  { %v110_v6 = vand.u32 %v287_v2, %v108_v5 }
   0x5   :  { %9 = vsyncpa [#allocation3], 0  ;;  %v302_v7 = vld [vmem:[%s468_s1] sm:$0xff]  ;;  %v297_v9 = vld [vmem:[%s467_s0 + $0x10] sm:$0xff]  ;;  %vm83_vm2 = vcmask 220160   ;;  %s240_s13 = sshll.u32 %s471_s4, 4  ;;  %s241_s13 = int_to_ptr.hbm [resolvable:$true] %s240_s13 }
   0x6   :  { %118 = vmatpush.bf16.msra.mxu0 %v110_v6  ;;  %345 = vmatpush.bf16.msra.mxu1 %v110_v6  ;;  %v295_v8 = vld [vmem:[%s467_s0] sm:$0xff]  ;;  %v300_v10 = vld [vmem:[%s467_s0 + $0x28] sm:$0xff]  ;;  %v298_v13 = vld [vmem:[%s467_s0 + $0x18] sm:$0xff]  ;;  %s385_s14 = smov 64   ;;  %s386_s15 = smov 4  }
   0x7   :  { %347 = vmatpush.bf16.msra.mxu3 %v110_v6  ;;  %346 = vmatpush.bf16.msra.mxu2 %v110_v6  ;;  %v299_v11 = vld [vmem:[%s467_s0 + $0x20] sm:$0xff]  ;;  %v296_v12 = vld [vmem:[%s467_s0 + $0x8] sm:$0xff]  ;;  %v301_v14 = vld [vmem:[%s467_s0 + $0x30] sm:$0xff]  ;;  %s384_s0 = smov [#allocation2]  }
   0x8   :  { %v355_v17 = vld [vmem:[%s469_s2] ss:$0 sm:$0xff]  ;;  %s238_s2 = sshll.u32 %s384_s0, 4  ;;  %s239_s2 = int_to_ptr.vmem [resolvable:$true] %s238_s2 }
   0x9   :  { %v448_v19 = vld [vmem:[%s470_s3] ss:$0 sm:$0xff] }
   0xa   :  { %119 = vmatpush.bf16.msra.mxu0 %v302_v7  ;;  %348 = vmatpush.bf16.msra.mxu1 %v302_v7 }
   0xb   :  { %350 = vmatpush.bf16.msra.mxu3 %v302_v7  ;;  %349 = vmatpush.bf16.msra.mxu2 %v302_v7 }
   0xd   :  { %288 = vmatmul.msk.bf16.vlgmr.msra.gmra.mxu0 %vm83_vm2, %v295_v8  ;;  %290 = vmatmul.msk.bf16.vlgmr.msra.gmra.mxu1 %vm83_vm2, %v297_v9 }
   0xe   :  { %293 = vmatmul.msk.bf16.vlgmr.msra.gmra.mxu3 %vm83_vm2, %v300_v10  ;;  %292 = vmatmul.msk.bf16.vlgmr.msra.gmra.mxu2 %vm83_vm2, %v299_v11 }
  0x1d   :  { %289 = vmatmul.msk.bf16.gmra.mxu0 %vm83_vm2, %v296_v12  ;;  %291 = vmatmul.msk.bf16.gmra.mxu1 %vm83_vm2, %v298_v13 }
  0x1e   :  { %294 = vmatmul.msk.bf16.gmra.mxu3 %vm83_vm2, %v301_v14 }
  0x8a   :  { %v121_v15 = vpop.f32.mrf.mxu0  ;;  %v131_v16 = vpop.f32.mrf.mxu1 }
  0x8b   :  { %v160_v18 = vmul.f32 %v355_v17, %v121_v15  ;;  %v164_v20 = vmul.f32 %v355_v17, %v131_v16 }
  0x8d   :  { %v178_v25 = vadd.f32 %v448_v19, %v160_v18  ;;  %v182_v26 = vadd.f32 %v448_v19, %v164_v20 }
  0x8f   :  { %v192_v33 = vmax.f32 %v178_v25, 0.0  ;;  %v196_v34 = vmax.f32 %v182_v26, 0.0 }
  0x91   :  { %v146_v21 = vpop.f32.mrf.mxu3  ;;  %v141_v22 = vpop.f32.mrf.mxu2 }
  0x92   :  { %v123_v23 = vpop.f32.mrf.mxu0  ;;  %v133_v24 = vpop.f32.mrf.mxu1  ;;  %v168_v29 = vmul.f32 %v355_v17, %v141_v22  ;;  %v170_v32 = vmul.f32 %v355_v17, %v146_v21 }
  0x93   :  { %v161_v27 = vmul.f32 %v355_v17, %v123_v23  ;;  %v165_v28 = vmul.f32 %v355_v17, %v133_v24 }
  0x94   :  { %v186_v37 = vadd.f32 %v448_v19, %v168_v29  ;;  %v188_v42 = vadd.f32 %v448_v19, %v170_v32 }
  0x95   :  { %v179_v30 = vadd.f32 %v448_v19, %v161_v27  ;;  %v183_v31 = vadd.f32 %v448_v19, %v165_v28 }
  0x96   :  { %v200_v47 = vmax.f32 %v186_v37, 0.0  ;;  %v202_v50 = vmax.f32 %v188_v42, 0.0 }
  0x97   :  { %v193_v35 = vmax.f32 %v179_v30, 0.0  ;;  %v197_v36 = vmax.f32 %v183_v31, 0.0 }
  0x99   :  { %v307_v38 = vpack.c.bf16 %v193_v35, %v192_v33  ;;  %v317_v39 = vpack.c.bf16 %v197_v36, %v196_v34  ;;  %v148_v40 = vpop.f32.mrf.mxu3  ;;  %v143_v41 = vpop.f32.mrf.mxu2 }
  0x9a   :  { %v171_v43 = vmul.f32 %v355_v17, %v148_v40  ;;  %v126_v44 = vpop.f32.mrf.mxu0  ;;  %v136_v45 = vpop.f32.mrf.mxu1  ;;  %v169_v46 = vmul.f32 %v355_v17, %v143_v41 }
  0x9b   :  { %308 = vst [vmem:[#allocation2] sm:$0xff] %v307_v38   ;;  %v162_v53 = vmul.f32 %v355_v17, %v126_v44  ;;  %v166_v54 = vmul.f32 %v355_v17, %v136_v45 }
  0x9c   :  { %340 = vst [vmem:[#allocation2 + $0x10] sm:$0xff] %v317_v39   ;;  %v189_v48 = vadd.f32 %v448_v19, %v171_v43  ;;  %v187_v49 = vadd.f32 %v448_v19, %v169_v46 }
  0x9d   :  { %v180_v60 = vadd.f32 %v448_v19, %v162_v53  ;;  %v184_v61 = vadd.f32 %v448_v19, %v166_v54 }
  0x9e   :  { %v203_v51 = vmax.f32 %v189_v48, 0.0  ;;  %v201_v52 = vmax.f32 %v187_v49, 0.0 }
  0x9f   :  { %v194_v3 = vmax.f32 %v180_v60, 0.0  ;;  %v198_v4 = vmax.f32 %v184_v61, 0.0 }
  0xa0   :  { %v332_v55 = vpack.c.bf16 %v203_v51, %v202_v50  ;;  %v327_v56 = vpack.c.bf16 %v201_v52, %v200_v47 }
  0xa1   :  { %v151_v57 = vpop.f32.mrf.mxu3 }
  0xa2   :  { %343 = vst [vmem:[#allocation2 + $0x28] sm:$0xff] %v332_v55   ;;  %v128_v58 = vpop.f32.mrf.mxu0  ;;  %v138_v59 = vpop.f32.mrf.mxu1  ;;  %v172_v2 = vmul.f32 %v355_v17, %v151_v57 }
  0xa3   :  { %342 = vst [vmem:[#allocation2 + $0x20] sm:$0xff] %v327_v56   ;;  %v163_v62 = vmul.f32 %v355_v17, %v128_v58  ;;  %v167_v63 = vmul.f32 %v355_v17, %v138_v59 }
  0xa4   :  { %v190_v10 = vadd.f32 %v448_v19, %v172_v2 }
  0xa5   :  { %v181_v0 = vadd.f32 %v448_v19, %v163_v62  ;;  %v185_v1 = vadd.f32 %v448_v19, %v167_v63 }
  0xa6   :  { %v204_v13 = vmax.f32 %v190_v10, 0.0 }
  0xa7   :  { %v195_v5 = vmax.f32 %v181_v0, 0.0  ;;  %v199_v6 = vmax.f32 %v185_v1, 0.0 }
  0xa9   :  { %v312_v7 = vpack.c.bf16 %v195_v5, %v194_v3  ;;  %v322_v8 = vpack.c.bf16 %v199_v6, %v198_v4  ;;  %v153_v9 = vpop.f32.mrf.mxu3 }
  0xaa   :  { %v173_v11 = vmul.f32 %v355_v17, %v153_v9 }
  0xab   :  { %339 = vst [vmem:[#allocation2 + $0x8] sm:$0xff] %v312_v7  }
  0xac   :  { %341 = vst [vmem:[#allocation2 + $0x18] sm:$0xff] %v322_v8   ;;  %v191_v12 = vadd.f32 %v448_v19, %v173_v11 }
  0xae   :  { %v205_v14 = vmax.f32 %v191_v12, 0.0 }
  0xb0   :  { %v337_v15 = vpack.c.bf16 %v205_v14, %v204_v13 }
  0xb2   :  { %344 = vst [vmem:[#allocation2 + $0x30] sm:$0xff] %v337_v15  }
  0xb3   :  { %246 = dma.vmem_to_hbm [thread:$0]  %s239_s2, 896, %s241_s13, [#allocation3], %s385_s14, %s385_s14, %s386_s15  }
  0xb4   :  { %381 = dma.done.wait [#allocation3], 896  }
  0xb5   :  { %382 = vsyncadd [#allocation3], 4294966400 }
  0xb6   :  { %251 = vsyncpa [#allocation3], 1 }

</bundles_post_ra>
